<compile_context>
chip_gen: v5e
topology: v5e:2x2
jax: 0.10.0
libtpu: 0.0.40
codegen_flags: <defaults>
</compile_context>

<pallas_src>
import jax
import jax.numpy as jnp
from jax import lax
from jax.experimental import pallas as pl
from jax.experimental.pallas import tpu as pltpu


PACK = 8  # original rows packed into one lane-dense row (sublane->lane factor)


def _round_up(n, m):
    return ((n + m - 1) // m) * m


def _linear_packed_kernel(x_ref, w_ref, b_ref, o_ref):
    # x_ref: (tm, PACK*F)      lane-dense packed activation tile (streams)
    # w_ref: (PACK*F, PACK*H)  block-diagonal W^T (VMEM-resident)
    # b_ref: (1, PACK*H)       bias tiled PACK times (VMEM-resident)
    # o_ref: (tm, PACK*H)
    acc = jnp.dot(x_ref[...], w_ref[...], preferred_element_type=jnp.float32)
    o_ref[...] = (acc + b_ref[...]).astype(o_ref.dtype)


def _sender_forward_pallas(x, weight, bias, *, block_rows):
    B, F = x.shape
    H = weight.shape[0]
    PF, PH = PACK * F, PACK * H

    # Pad the batch only up to the pack factor (<= PACK-1 rows), never to a
    # full tile; skip entirely when already aligned.
    Bp = _round_up(B, PACK)
    if Bp != B:
        x = jnp.pad(x, ((0, Bp - B), (0, 0)))
    n_rows = Bp // PACK

    # Lane-dense packing: PACK consecutive batch rows share one 128-lane row.
    # TODO(synk): ideally the producer/consumer of x/y keeps this packed
    # layout so this reshape is not an extra relayout pass over HBM.
    xp = x.reshape(n_rows, PF)

    # Block-diagonal, pre-transposed weight: block (j, j) of size (F, H) is
    # W^T, so y_packed[r, j*H:(j+1)*H] = x[PACK*r + j] @ W^T.
    wt = weight.T.astype(x.dtype)                               # (F, H)
    eye = jnp.eye(PACK, dtype=x.dtype)
    w_bd = (eye[:, None, :, None] * wt[None, :, None, :]).reshape(PF, PH)
    b_pk = jnp.tile(bias.astype(x.dtype), PACK).reshape(1, PH)

    # Batch-tile size: multiple of 8 sublanes, >= 2 grid steps whenever the
    # batch allows (keeps both v7x TensorCores busy), capped so the
    # double-buffered tiles stay well inside v5e's 16 MiB scoped-VMEM default.
    if n_rows < 16:
        tm = n_rows                       # single block == full axis
    else:
        tm = min(block_rows, _round_up(pl.cdiv(n_rows, 2), 8))
    grid = (pl.cdiv(n_rows, tm),)         # ragged last tile handled by Pallas

    yp = pl.pallas_call(
        _linear_packed_kernel,
        out_shape=jax.ShapeDtypeStruct((n_rows, PH), x.dtype),
        grid=grid,
        in_specs=[
            pl.BlockSpec((tm, PF), lambda i: (i, 0)),   # x tiles stream
            pl.BlockSpec((PF, PH), lambda i: (0, 0)),   # weight stays resident
            pl.BlockSpec((1, PH), lambda i: (0, 0)),    # bias stays resident
        ],
        out_specs=pl.BlockSpec((tm, PH), lambda i: (i, 0)),
        compiler_params=pltpu.CompilerParams(
            dimension_semantics=("parallel",),  # shard batch tiles across TCs
        ),
    )(xp, w_bd, b_pk)

    y = yp.reshape(Bp, H)
    return y[:B] if Bp != B else y


def sender_forward(x, weight, bias, *, block_rows=2048, min_pallas_batch=2048):
    """Equivalent to PyTorch Sender.forward(x, _aux_input) == fc1(x).

    x:      (B, F) float32
    weight: (H, F) float32  (PyTorch nn.Linear convention)
    bias:   (H,)   float32
    returns (B, H) float32
    """
    B, F = x.shape
    H, F_w = weight.shape
    assert F == F_w, "weight must be (n_hidden, n_features)"

    if B < min_pallas_batch:
        # Tiny batches: pallas_call launch + pack/unpack overhead dominates;
        # plain XLA is at least as fast.
        return x @ weight.T + bias
    return _sender_forward_pallas(x, weight, bias, block_rows=block_rows)


if __name__ == "__main__":
    # Shapes consistent with the module: n_features=16, n_hidden=32.
    n_features, n_hidden = 16, 32

    key = jax.random.PRNGKey(0)
    kx1, kx2, kx3, kw, kb = jax.random.split(key, 5)

    bound = 1.0 / (n_features ** 0.5)
    weight = jax.random.uniform(kw, (n_hidden, n_features), jnp.float32, -bound, bound)
    bias = jax.random.uniform(kb, (n_hidden,), jnp.float32, -bound, bound)

    def ref(xx):
        return jnp.dot(xx, weight.T, precision=lax.Precision.HIGHEST) + bias

    # Case 1: toy batch -> small-batch fast path (plain XLA).
    x1 = jax.random.normal(kx1, (4, n_features), dtype=jnp.float32)
    y1 = sender_forward(x1, weight, bias)
    jax.block_until_ready(y1)
    assert y1.shape == (4, n_hidden)
    assert jnp.allclose(y1, ref(x1), atol=1e-5, rtol=1e-5)

    # Case 2: force the Pallas path on a small, non-multiple-of-8 batch
    # (exercises pad-to-PACK + single full-extent block).
    x2 = jax.random.normal(kx2, (20, n_features), dtype=jnp.float32)
    y2 = sender_forward(x2, weight, bias, min_pallas_batch=0)
    jax.block_until_ready(y2)
    assert y2.shape == (20, n_hidden)
    assert jnp.allclose(y2, ref(x2), atol=1e-5, rtol=1e-5)

    # Case 3: batch large enough to take the Pallas path by default
    # (multiple grid steps + ragged last tile + pad-to-PACK path).
    x3 = jax.random.normal(kx3, (4100, n_features), dtype=jnp.float32)
    y3 = sender_forward(x3, weight, bias)
    jax.block_until_ready(y3)
    assert y3.shape == (4100, n_hidden)
    assert jnp.allclose(y3, ref(x3), atol=1e-5, rtol=1e-5)

    print("KERNEL_OK")
</pallas_src>

<mosaic_0001>
module attributes {stable_mosaic.version = 11 : i64} {
  func.func @_linear_packed_kernel(%arg0: i32, %arg1: memref<3x128xf32, #tpu.memory_space<vmem>>, %arg2: memref<128x256xf32, #tpu.memory_space<vmem>>, %arg3: memref<1x256xf32, #tpu.memory_space<vmem>>, %arg4: memref<3x256xf32, #tpu.memory_space<vmem>>) attributes {dimension_semantics = [#tpu.dimension_semantics<parallel>], iteration_bounds = array<i64: 1>, scalar_prefetch = 0 : i64, scratch_operands = 0 : i64, tpu.core_type = #tpu.core_type<tc>, window_params = [{transform_indices = @transform_0, window_bounds = array<i64: 3, 128>}, {pipeline_mode = #tpu.pipeline_mode<synchronous>, transform_indices = @transform_1, window_bounds = array<i64: 128, 256>}, {pipeline_mode = #tpu.pipeline_mode<synchronous>, transform_indices = @transform_2, window_bounds = array<i64: 1, 256>}, {transform_indices = @transform_3, window_bounds = array<i64: 3, 256>}]} {
    %c0 = arith.constant 0 : index
    %c0_0 = arith.constant 0 : index
    %0 = vector.load %arg1[%c0, %c0_0] : memref<3x128xf32, #tpu.memory_space<vmem>>, vector<3x128xf32>
    %c0_1 = arith.constant 0 : index
    %c0_2 = arith.constant 0 : index
    %1 = vector.load %arg2[%c0_1, %c0_2] : memref<128x256xf32, #tpu.memory_space<vmem>>, vector<128x256xf32>
    %cst = arith.constant dense<0.000000e+00> : vector<3x256xf32>
    %2 = tpu.matmul %0, %1, %cst {dimension_numbers = #tpu.dot_dimension_numbers<[1], [0], [0], [1], [0, 0, 1, 1], [], []>} : vector<3x128xf32>, vector<128x256xf32>, vector<3x256xf32> -> vector<3x256xf32>
    %c0_3 = arith.constant 0 : index
    %c0_4 = arith.constant 0 : index
    %3 = vector.load %arg3[%c0_3, %c0_4] : memref<1x256xf32, #tpu.memory_space<vmem>>, vector<1x256xf32>
    %4 = vector.broadcast %3 : vector<1x256xf32> to vector<3x256xf32>
    %5 = arith.addf %2, %4 : vector<3x256xf32>
    %c0_5 = arith.constant 0 : index
    %c0_6 = arith.constant 0 : index
    %6 = vector.load %arg4[%c0_5, %c0_6] : memref<3x256xf32, #tpu.memory_space<vmem>>, vector<3x256xf32>
    tpu.vector_store %arg4[%c0_5, %c0_6], %5 {strides = array<i32>} : memref<3x256xf32, #tpu.memory_space<vmem>>, vector<3x256xf32>,
    return
  }
  func.func @transform_0(%arg0: i32) -> (i32, i32) {
    %c0_i32 = arith.constant 0 : i32
    %c0_i32_0 = arith.constant 0 : i32
    return %arg0, %c0_i32 : i32, i32
  }
  func.func @transform_1(%arg0: i32) -> (i32, i32) {
    %c0_i32 = arith.constant 0 : i32
    %c0_i32_0 = arith.constant 0 : i32
    %c0_i32_1 = arith.constant 0 : i32
    return %c0_i32, %c0_i32_0 : i32, i32
  }
  func.func @transform_2(%arg0: i32) -> (i32, i32) {
    %c0_i32 = arith.constant 0 : i32
    %c0_i32_0 = arith.constant 0 : i32
    %c0_i32_1 = arith.constant 0 : i32
    return %c0_i32, %c0_i32_0 : i32, i32
  }
  func.func @transform_3(%arg0: i32) -> (i32, i32) {
    %c0_i32 = arith.constant 0 : i32
    %c0_i32_0 = arith.constant 0 : i32
    return %arg0, %c0_i32 : i32, i32
  }
}

</mosaic_0001>

<bundles_post_ra>
// kernel: tpu_custom_call.1
= control target key start
LH: loop header
LB: loop body
LE: loop exit
PB: predicated region body
PF: predicated region fallthrough
CT: control target
= control target key end

     0   :  { %8 = vsyncpa [#allocation3], 0  ;;  %s308_s0 = inlined_call_operand.hbm [shape: f32[3,128], index: 0, kind: input, shape index: {}]   ;;  %s309_s1 = inlined_call_operand.hbm [shape: f32[128,256], index: 1, kind: input, shape index: {}]   ;;  %s310_s2 = inlined_call_operand.hbm [shape: f32[1,256], index: 2, kind: input, shape index: {}]   ;;  %s311_s3 = inlined_call_operand.hbm [shape: f32[3,256], index: 3, kind: output, shape index: {}]  }
   0x1   :  { %9 = vsyncpa [#allocation6], 0  ;;  %s26_s14 = sshll.u32 %s309_s1, 4  ;;  %s27_s14 = int_to_ptr.hbm [resolvable:$true] %s26_s14 }
   0x2   :  { %10 = vsyncpa [#allocation4], 0  ;;  %s270_s15 = smov [#allocation5]   ;;  %s16_s19 = sshll.u32 %s308_s0, 4  ;;  %s17_s19 = int_to_ptr.hbm [resolvable:$true] %s16_s19 }
   0x3   :  { %s28_s16 = sshll.u32 %s270_s15, 4  ;;  %s271_s20 = smov 256   ;;  %s29_s16 = int_to_ptr.vmem [resolvable:$true] %s28_s16 }
   0x4   :  { %s272_s21 = smov 16   ;;  %s273_s22 = smov [#allocation2]  }
   0x5   :  { %34 = dma.hbm_to_vmem [thread:$0]  %s27_s14, 4096, %s29_s16, [#allocation6], %s271_s20, %s271_s20, %s272_s21  }
   0x6   :  { %s18_s23 = sshll.u32 %s273_s22, 4  ;;  %s40_s26 = sshll.u32 %s310_s2, 4  ;;  %s19_s23 = int_to_ptr.vmem [resolvable:$true] %s18_s23  ;;  %s41_s26 = int_to_ptr.hbm [resolvable:$true] %s40_s26 }
   0x7   :  { %21 = dma.hbm_to_vmem [thread:$0]  %s17_s19, 64, %s19_s23, [#allocation3]  }
   0x8   :  { %s274_s1 = smov [#allocation7]  }
   0x9   :  { %s42_s27 = sshll.u32 %s274_s1, 4  ;;  %s43_s27 = int_to_ptr.vmem [resolvable:$true] %s42_s27 }
   0xa   :  { %45 = dma.hbm_to_vmem [thread:$0]  %s41_s26, 32, %s43_s27, [#allocation6]  }
   0xb   :  { %264 = dma.done.wait [#allocation3], 64  }
   0xc   :  { %265 = vsyncadd [#allocation3], 4294967232 }
   0xd   :  { %266 = dma.done.wait [#allocation6], 4128  }
   0xe   :  { %267 = vsyncadd [#allocation6], 4294963168  ;;  %v90_v0 = vld [vmem:[#allocation5 + $0xf8] sm:$0xff]  ;;  %v89_v1 = vld [vmem:[#allocation5 + $0xf0] sm:$0xff]  ;;  %s275_s0 = smov [#allocation8]   ;;  %s151_s30 = sshll.u32 %s311_s3, 4  ;;  %s152_s30 = int_to_ptr.hbm [resolvable:$true] %s151_s30 }
   0xf   :  { %v88_v2 = vld [vmem:[#allocation5 + $0xe8] sm:$0xff]  ;;  %117 = vmatpush.msra.mxu1 %v90_v0  ;;  %97 = vmatpush.msra.mxu0 %v89_v1  ;;  %v87_v3 = vld [vmem:[#allocation5 + $0xe0] sm:$0xff]  ;;  %v86_v4 = vld [vmem:[#allocation5 + $0xd8] sm:$0xff]  ;;  %s149_s2 = sshll.u32 %s275_s0, 4  ;;  %vm140_vm0 = vcmask 1043456   ;;  %s150_s2 = int_to_ptr.vmem [resolvable:$true] %s149_s2 }
  0x10   :  { %v85_v5 = vld [vmem:[#allocation5 + $0xd0] sm:$0xff]  ;;  %v84_v6 = vld [vmem:[#allocation5 + $0xc8] sm:$0xff]  ;;  %v83_v7 = vld [vmem:[#allocation5 + $0xc0] sm:$0xff] }
  0x11   :  { %118 = vmatpush.msra.mxu1 %v88_v2  ;;  %98 = vmatpush.msra.mxu0 %v87_v3  ;;  %v82_v8 = vld [vmem:[#allocation5 + $0xb8] sm:$0xff]  ;;  %v81_v9 = vld [vmem:[#allocation5 + $0xb0] sm:$0xff]  ;;  %v80_v10 = vld [vmem:[#allocation5 + $0xa8] sm:$0xff] }
  0x12   :  { %v79_v11 = vld [vmem:[#allocation5 + $0xa0] sm:$0xff]  ;;  %v78_v12 = vld [vmem:[#allocation5 + $0x98] sm:$0xff]  ;;  %v77_v13 = vld [vmem:[#allocation5 + $0x90] sm:$0xff] }
  0x13   :  { %119 = vmatpush.msra.mxu1 %v86_v4  ;;  %99 = vmatpush.msra.mxu0 %v85_v5  ;;  %v76_v14 = vld [vmem:[#allocation5 + $0x88] sm:$0xff]  ;;  %v75_v15 = vld [vmem:[#allocation5 + $0x80] sm:$0xff]  ;;  %v74_v16 = vld [vmem:[#allocation5 + $0x78] sm:$0xff] }
  0x14   :  { %v73_v17 = vld [vmem:[#allocation5 + $0x70] sm:$0xff]  ;;  %v72_v18 = vld [vmem:[#allocation5 + $0x68] sm:$0xff]  ;;  %v71_v19 = vld [vmem:[#allocation5 + $0x60] sm:$0xff] }
  0x15   :  { %120 = vmatpush.msra.mxu1 %v84_v6  ;;  %100 = vmatpush.msra.mxu0 %v83_v7  ;;  %v70_v20 = vld [vmem:[#allocation5 + $0x58] sm:$0xff]  ;;  %v69_v21 = vld [vmem:[#allocation5 + $0x50] sm:$0xff]  ;;  %v68_v22 = vld [vmem:[#allocation5 + $0x48] sm:$0xff] }
  0x16   :  { %v67_v23 = vld [vmem:[#allocation5 + $0x40] sm:$0xff]  ;;  %v66_v24 = vld [vmem:[#allocation5 + $0x38] sm:$0xff]  ;;  %v65_v25 = vld [vmem:[#allocation5 + $0x30] sm:$0xff] }
  0x17   :  { %121 = vmatpush.msra.mxu1 %v82_v8  ;;  %101 = vmatpush.msra.mxu0 %v81_v9  ;;  %v64_v26 = vld [vmem:[#allocation5 + $0x28] sm:$0xff]  ;;  %v63_v27 = vld [vmem:[#allocation5 + $0x20] sm:$0xff]  ;;  %v62_v28 = vld [vmem:[#allocation5 + $0x18] sm:$0xff] }
  0x18   :  { %v61_v29 = vld [vmem:[#allocation5 + $0x10] sm:$0xff]  ;;  %v60_v30 = vld [vmem:[#allocation5 + $0x8] sm:$0xff]  ;;  %v59_v31 = vld [vmem:[#allocation5] sm:$0xff] }
  0x19   :  { %122 = vmatpush.msra.mxu1 %v80_v10  ;;  %102 = vmatpush.msra.mxu0 %v79_v11  ;;  %v58_v32 = vld [vmem:[#allocation2] sm:$0x7]  ;;  %v91_v33 = vld [vmem:[#allocation7] sm:$0x3] }
  0x1a   :  { %v94_v34 = vperm.slane %v91_v33, 1  ;;  %v93_v35 = vperm.slane %v91_v33, 0 }
  0x1b   :  { %123 = vmatpush.msra.mxu1 %v78_v12  ;;  %103 = vmatpush.msra.mxu0 %v77_v13 }
  0x1d   :  { %124 = vmatpush.msra.mxu1 %v76_v14  ;;  %104 = vmatpush.msra.mxu0 %v75_v15 }
  0x1f   :  { %125 = vmatpush.msra.mxu1 %v74_v16  ;;  %105 = vmatpush.msra.mxu0 %v73_v17 }
  0x21   :  { %126 = vmatpush.msra.mxu1 %v72_v18  ;;  %106 = vmatpush.msra.mxu0 %v71_v19 }
  0x23   :  { %127 = vmatpush.msra.mxu1 %v70_v20  ;;  %107 = vmatpush.msra.mxu0 %v69_v21 }
  0x25   :  { %128 = vmatpush.msra.mxu1 %v68_v22  ;;  %108 = vmatpush.msra.mxu0 %v67_v23 }
  0x27   :  { %129 = vmatpush.msra.mxu1 %v66_v24  ;;  %109 = vmatpush.msra.mxu0 %v65_v25 }
  0x29   :  { %130 = vmatpush.msra.mxu1 %v64_v26  ;;  %110 = vmatpush.msra.mxu0 %v63_v27 }
  0x2b   :  { %131 = vmatpush.msra.mxu1 %v62_v28  ;;  %111 = vmatpush.msra.mxu0 %v61_v29 }
  0x2d   :  { %132 = vmatpush.msra.mxu1 %v60_v30  ;;  %112 = vmatpush.msra.mxu0 %v59_v31 }
  0x2e   :  { %133 = vmatmul.f32.vlgmr.msra.gmra.mxu1 %v58_v32  ;;  %113 = vmatmul.f32.vlgmr.msra.gmra.mxu0 %v58_v32 }
  0xab   :  { %v134_v36 = vpop.f32.mrf.mxu1  ;;  %v114_v37 = vpop.f32.mrf.mxu0 }
  0xac   :  { %v135_v38 = vadd.f32 %v134_v36, %v94_v34  ;;  %v115_v39 = vadd.f32 %v114_v37, %v93_v35 }
  0xae   :  { %v139_v40 = vrot.slane %v135_v38, 4 }
  0xb0   :  { %v141_v41 = vsel %vm140_vm0, %v115_v39, %v139_v40 }
  0xb1   :  { %143 = vst [vmem:[#allocation8] sm:$0x77] %v141_v41 }
  0xb2   :  { %154 = dma.vmem_to_hbm [thread:$0]  %s150_s2, 128, %s152_s30, [#allocation4]  }
  0xb3   :  { %268 = dma.done.wait [#allocation4], 128  }
  0xb4   :  { %269 = vsyncadd [#allocation4], 4294967168 }
  0xb5   :  { %159 = vsyncpa [#allocation3], 1 }
  0xb6   :  { %160 = vsyncpa [#allocation6], 1 }
  0xb7   :  { %161 = vsyncpa [#allocation4], 1 }

</bundles_post_ra>
